<compile_context>
chip_gen: v7x
topology: tpu7x:2x2x1
jax: 0.10.0
libtpu: 0.0.40
codegen_flags: <defaults>
</compile_context>

<pallas_src>
import functools
import math

import jax
import jax.numpy as jnp
from jax.experimental import pallas as pl
from jax.experimental.pallas import tpu as pltpu


def _post_level_attn2_kernel(x_ref, wp_ref, wq_ref, o_ref, *, out_feats):
    x = x_ref[...]
    # Two MXU matmuls against resident block-diagonal weights (f32 accumulate):
    #   P = [h_x | h_c] per packed row-group,  Q = [h_c | h_x] (swapped).
    p = jnp.dot(x, wp_ref[...], preferred_element_type=jnp.float32)
    q = jnp.dot(x, wq_ref[...], preferred_element_type=jnp.float32)
    g = jax.nn.sigmoid(p + q)                 # EUP slot — effectively free
    h = q + g * (p - q)                       # == g*h_x + (1-g)*h_c on the h lanes
    lane = jax.lax.broadcasted_iota(jnp.int32, p.shape, 1)
    is_h_lane = (lane % (2 * out_feats)) < out_feats
    # Per row-group the output is [h | h_x]; the h_x lanes are exactly Q's lanes.
    o_ref[...] = jnp.where(is_h_lane, h, q).astype(o_ref.dtype)


def _pack_factor(in_width, out_width, max_pack=8):
    """Rows packed per super-row so both packed widths are multiples of 128."""
    p_in = 128 // math.gcd(128, in_width)
    p_out = 128 // math.gcd(128, out_width)
    pack = p_in * p_out // math.gcd(p_in, p_out)
    return pack if pack <= max_pack else 1


def pack_post_level_attention2_weights(w_post, w_claim, *, dtype=None):
    """One-time weight packing — hoist out of the per-call forward path.

    w_post:  [out_feats, hidden_feats]   (torch nn.Linear weight layout)
    w_claim: [out_feats, claim_feats]
    Returns ((W_P, W_Q), pack), each weight [pack*F, pack*2*out].
    """
    out_feats, hidden_feats = w_post.shape
    _, claim_feats = w_claim.shape
    f = hidden_feats + claim_feats
    dtype = dtype or w_post.dtype
    pack = _pack_factor(f, 2 * out_feats)

    wp_t = jnp.asarray(w_post, dtype).T            # [hidden, out]
    wc_t = jnp.asarray(w_claim, dtype).T           # [claim,  out]
    z_top = jnp.zeros((hidden_feats, out_feats), dtype)
    z_bot = jnp.zeros((claim_feats, out_feats), dtype)
    # Per-row maps:  x_row -> [h_x | h_c]   and the swapped  x_row -> [h_c | h_x].
    w_bd = jnp.concatenate(
        [jnp.concatenate([wp_t, z_top], axis=1),
         jnp.concatenate([z_bot, wc_t], axis=1)], axis=0)          # [F, 2*out]
    w_sw = jnp.concatenate(
        [jnp.concatenate([z_top, wp_t], axis=1),
         jnp.concatenate([wc_t, z_bot], axis=1)], axis=0)          # [F, 2*out]
    eye = jnp.eye(pack, dtype=dtype)
    w_p = jnp.kron(eye, w_bd)                       # [pack*F, pack*2*out]
    w_q = jnp.kron(eye, w_sw)
    return (w_p, w_q), pack


def post_level_attention2(x, packed_weights, *, out_feats, row_tile=8192):
    """x: [N, hidden_feats + claim_feats]  ->  [N, 2*out_feats]."""
    w_p, w_q = packed_weights
    n, f = x.shape
    half_in, half_out = w_p.shape
    pack = half_in // f
    assert half_in == pack * f and half_out == pack * 2 * out_feats

    # Pack `pack` rows per lane-dense super-row (row-major reshape is free).
    n_pad = -(-n // pack) * pack
    if n_pad != n:
        x = jnp.pad(x, ((0, n_pad - n), (0, 0)))
    n_super = n_pad // pack
    x2 = x.reshape(n_super, half_in)

    # Row tile (in super-rows): largest within budget, but capped at ceil(n/2)
    # so the "parallel" grid has >= 2 steps and shards across v7x's 2 TCs.
    if n_super <= 8:
        tn = n_super
    else:
        tn = min(row_tile, -(-n_super // 2))
        tn = -(-tn // 8) * 8
    grid = (pl.cdiv(n_super, tn),)

    itemsize = jnp.dtype(x.dtype).itemsize
    cost = pl.CostEstimate(
        flops=2 * 2 * n_super * half_in * half_out,
        transcendentals=n_super * half_out,
        bytes_accessed=(x2.size + n_super * half_out + w_p.size + w_q.size) * itemsize,
    )

    kernel = functools.partial(_post_level_attn2_kernel, out_feats=out_feats)
    out2 = pl.pallas_call(
        kernel,
        out_shape=jax.ShapeDtypeStruct((n_super, half_out), x.dtype),
        grid=grid,
        in_specs=[
            pl.BlockSpec((tn, half_in), lambda i: (i, 0)),           # row-tiled x
            pl.BlockSpec((half_in, half_out), lambda i: (0, 0)),     # resident W_P
            pl.BlockSpec((half_in, half_out), lambda i: (0, 0)),     # resident W_Q
        ],
        out_specs=pl.BlockSpec((tn, half_out), lambda i: (i, 0)),
        compiler_params=pltpu.CompilerParams(
            dimension_semantics=("parallel",),
            vmem_limit_bytes=48 * 1024 * 1024,
        ),
        cost_estimate=cost,
    )(x2, w_p, w_q)

    out = out2.reshape(n_pad, 2 * out_feats)
    return out if n_pad == n else out[:n]


def _reference(x, w_post, w_claim, out_feats):
    h_x = x[:, :out_feats] @ w_post.T
    h_c = x[:, out_feats:] @ w_claim.T
    g = jax.nn.sigmoid(h_x + h_c)
    h = g * h_x + (1.0 - g) * h_c
    return jnp.concatenate((h, h_x), axis=-1)


if __name__ == "__main__":
    # Small shapes consistent with the module (hidden == out is forced by the
    # forward's slicing).  n_posts is odd so the pack-padding path and a
    # partial edge tile are both exercised with row_tile=8.
    hidden_feats = 32
    claim_feats = 32
    out_feats = 32
    n_posts = 41

    key = jax.random.PRNGKey(0)
    kx, kp, kc = jax.random.split(key, 3)
    x = jax.random.normal(kx, (n_posts, hidden_feats + claim_feats), dtype=jnp.float32)
    # torch Linear weight layout: [out_features, in_features].
    w_post = jax.random.normal(kp, (out_feats, hidden_feats), dtype=jnp.float32) * 0.1
    w_claim = jax.random.normal(kc, (out_feats, claim_feats), dtype=jnp.float32) * 0.1

    packed, pack = pack_post_level_attention2_weights(w_post, w_claim)
    out = post_level_attention2(x, packed, out_feats=out_feats, row_tile=8)
    out = jax.block_until_ready(out)

    ref = _reference(x, w_post, w_claim, out_feats)
    assert out.shape == (n_posts, 2 * out_feats), out.shape
    assert jnp.allclose(out, ref, atol=2e-5, rtol=2e-5), float(jnp.max(jnp.abs(out - ref)))

    print("KERNEL_OK")
</pallas_src>

<mosaic_0001>
module attributes {stable_mosaic.version = 11 : i64} {
  func.func @_post_level_attn2_kernel(%arg0: i32, %arg1: memref<8x128xf32, #tpu.memory_space<vmem>>, %arg2: memref<128x128xf32, #tpu.memory_space<vmem>>, %arg3: memref<128x128xf32, #tpu.memory_space<vmem>>, %arg4: memref<8x128xf32, #tpu.memory_space<vmem>>) attributes {dimension_semantics = [#tpu.dimension_semantics<parallel>], iteration_bounds = array<i64: 3>, scalar_prefetch = 0 : i64, scratch_operands = 0 : i64, tpu.core_type = #tpu.core_type<tc>, window_params = [{transform_indices = @transform_0, window_bounds = array<i64: 8, 128>}, {pipeline_mode = #tpu.pipeline_mode<synchronous>, transform_indices = @transform_1, window_bounds = array<i64: 128, 128>}, {pipeline_mode = #tpu.pipeline_mode<synchronous>, transform_indices = @transform_2, window_bounds = array<i64: 128, 128>}, {transform_indices = @transform_3, window_bounds = array<i64: 8, 128>}]} {
    %c0 = arith.constant 0 : index
    %c0_0 = arith.constant 0 : index
    %0 = vector.load %arg1[%c0, %c0_0] : memref<8x128xf32, #tpu.memory_space<vmem>>, vector<8x128xf32>
    %c0_1 = arith.constant 0 : index
    %c0_2 = arith.constant 0 : index
    %1 = vector.load %arg2[%c0_1, %c0_2] : memref<128x128xf32, #tpu.memory_space<vmem>>, vector<128x128xf32>
    %cst = arith.constant dense<0.000000e+00> : vector<8x128xf32>
    %2 = tpu.matmul %0, %1, %cst {dimension_numbers = #tpu.dot_dimension_numbers<[1], [0], [0], [1], [0, 0, 1, 1], [], []>} : vector<8x128xf32>, vector<128x128xf32>, vector<8x128xf32> -> vector<8x128xf32>
    %c0_3 = arith.constant 0 : index
    %c0_4 = arith.constant 0 : index
    %3 = vector.load %arg3[%c0_3, %c0_4] : memref<128x128xf32, #tpu.memory_space<vmem>>, vector<128x128xf32>
    %cst_5 = arith.constant dense<0.000000e+00> : vector<8x128xf32>
    %4 = tpu.matmul %0, %3, %cst_5 {dimension_numbers = #tpu.dot_dimension_numbers<[1], [0], [0], [1], [0, 0, 1, 1], [], []>} : vector<8x128xf32>, vector<128x128xf32>, vector<8x128xf32> -> vector<8x128xf32>
    %5 = arith.addf %2, %4 : vector<8x128xf32>
    %6 = arith.negf %5 : vector<8x128xf32>
    %7 = math.exp %6 : vector<8x128xf32>
    %cst_6 = arith.constant 1.000000e+00 : f32
    %8 = vector.broadcast %cst_6 : f32 to vector<8x128xf32>
    %9 = arith.addf %8, %7 : vector<8x128xf32>
    %10 = arith.divf %8, %9 : vector<8x128xf32>
    %11 = arith.subf %2, %4 : vector<8x128xf32>
    %12 = arith.mulf %10, %11 : vector<8x128xf32>
    %13 = arith.addf %4, %12 : vector<8x128xf32>
    %14 = tpu.iota {dimensions = array<i32: 1>} : vector<8x128xi32>
    %c64_i32 = arith.constant 64 : i32
    %c0_i32 = arith.constant 0 : i32
    %15 = arith.cmpi eq, %c64_i32, %c0_i32 : i32
    %c1_i32 = arith.constant 1 : i32
    %16 = arith.select %15, %c1_i32, %c64_i32 : i32
    %17 = vector.broadcast %16 : i32 to vector<8x128xi32>
    %18 = arith.remsi %14, %17 : vector<8x128xi32>
    %c0_i32_7 = arith.constant 0 : i32
    %19 = vector.broadcast %c0_i32_7 : i32 to vector<8x128xi32>
    %20 = arith.cmpi ne, %18, %19 : vector<8x128xi32>
    %c0_i32_8 = arith.constant 0 : i32
    %21 = vector.broadcast %c0_i32_8 : i32 to vector<8x128xi32>
    %22 = arith.cmpi slt, %18, %21 : vector<8x128xi32>
    %c0_i32_9 = arith.constant 0 : i32
    %23 = arith.cmpi slt, %16, %c0_i32_9 : i32
    %24 = vector.broadcast %23 : i1 to vector<8x128xi1>
    %25 = vector.broadcast %24 : vector<8x128xi1> to vector<8x128xi1>
    %26 = arith.xori %22, %25 : vector<8x128xi1>
    %27 = arith.andi %26, %20 : vector<8x128xi1>
    %28 = vector.broadcast %16 : i32 to vector<8x128xi32>
    %29 = arith.addi %18, %28 : vector<8x128xi32>
    %30 = arith.select %27, %29, %18 : vector<8x128xi1>, vector<8x128xi32>
    %c32_i32 = arith.constant 32 : i32
    %31 = vector.broadcast %c32_i32 : i32 to vector<8x128xi32>
    %32 = arith.cmpi slt, %30, %31 : vector<8x128xi32>
    %33 = arith.select %32, %13, %4 : vector<8x128xi1>, vector<8x128xf32>
    %c0_10 = arith.constant 0 : index
    %c0_11 = arith.constant 0 : index
    %34 = vector.load %arg4[%c0_10, %c0_11] : memref<8x128xf32, #tpu.memory_space<vmem>>, vector<8x128xf32>
    tpu.vector_store %arg4[%c0_10, %c0_11], %33 {strides = array<i32>} : memref<8x128xf32, #tpu.memory_space<vmem>>, vector<8x128xf32>,
    return
  }
  func.func @transform_0(%arg0: i32) -> (i32, i32) {
    %c0_i32 = arith.constant 0 : i32
    %c0_i32_0 = arith.constant 0 : i32
    return %arg0, %c0_i32 : i32, i32
  }
  func.func @transform_1(%arg0: i32) -> (i32, i32) {
    %c0_i32 = arith.constant 0 : i32
    %c0_i32_0 = arith.constant 0 : i32
    %c0_i32_1 = arith.constant 0 : i32
    return %c0_i32, %c0_i32_0 : i32, i32
  }
  func.func @transform_2(%arg0: i32) -> (i32, i32) {
    %c0_i32 = arith.constant 0 : i32
    %c0_i32_0 = arith.constant 0 : i32
    %c0_i32_1 = arith.constant 0 : i32
    return %c0_i32, %c0_i32_0 : i32, i32
  }
  func.func @transform_3(%arg0: i32) -> (i32, i32) {
    %c0_i32 = arith.constant 0 : i32
    %c0_i32_0 = arith.constant 0 : i32
    return %arg0, %c0_i32 : i32, i32
  }
}

</mosaic_0001>

<bundles_post_ra>
// kernel: tpu_custom_call.1
= control target key start
LH: loop header
LB: loop body
LE: loop exit
PB: predicated region body
PF: predicated region fallthrough
CT: control target
= control target key end

     0   :  { %8 = vsyncpa [#allocation3], 0  ;;  %s1193_s0 = inlined_call_operand.hbm [shape: f32[21,128], index: 0, kind: input, shape index: {}]   ;;  %s1194_s1 = inlined_call_operand.hbm [shape: f32[128,128], index: 1, kind: input, shape index: {}]   ;;  %s1195_s2 = inlined_call_operand.hbm [shape: f32[128,128], index: 2, kind: input, shape index: {}]   ;;  %s1196_s3 = inlined_call_operand.hbm [shape: f32[21,128], index: 3, kind: output, shape index: {}]  }
   0x1   :  { %10 = vsyncpa [#allocation3 + $0x1], 0 }
   0x2   :  { %11 = vsyncpa [#allocation6], 0 }
   0x3   :  { %12 = vsyncpa [#allocation4], 0 }
   0x4   :  { %14 = vsyncpa [#allocation4 + $0x1], 0  ;;  %s950_s12 = smov 0   ;;  %s952_s13 = smov 0  }
   0x5   :  { %s954_s14 = smov 0   ;;  %s956_s15 = smov 0  }
   0x6 LB: > { %s971_s16 = sadd.s32 4294967295, %s919_s15   ;;  %s518_s17 = sadd.s32 4294967294, %s919_s15   ;;  %s919_s15 = sphi %s956_s15, %s1215_s15   ;;  %s915_s14 = sphi %s954_s14, %s1214_s14   ;;  %s911_s13 = sphi %s952_s13, %s1213_s13   ;;  %s907_s12 = sphi %s950_s12, %s1212_s12  }
   0x7   : > { %p40_p0 = scmp.ne.s32.totalorder %s911_s13, %s907_s12  ;;  %p1197_p1 = scmp.eq.s32.totalorder %s971_s16, 0 }
   0x8   : > { %p112_p3 = scmp.eq.s32.totalorder %s518_s17, 2  ;;  %p519_p5 = scmp.ge.s32.totalorder %s919_s15, 1 }
   0x9   : > { %p980_p4 = por %p1197_p1, %p40_p0  ;;  %p119_p7 = scmp.lt.s32.totalorder %s919_s15, 4 }
   0xa   : > { %p985_p6 = por %p112_p3, %p40_p0  ;;  %s921_s21 = smov [#allocation5]  }
   0xb   : > { %s1200_s18 = scalar_select %p980_p4, 1, 0 }
   0xc   : > { %s1201_s19 = scalar_select %p985_p6, 1, 0 }
   0xd   : > { %p990_p8 = pnand %p519_p5, %p119_p7  ;;  %s131_s22 = sshll.u32 %s921_s21, 4  ;;  %s132_s22 = int_to_ptr.vmem [resolvable:$true] %s131_s22 }
   0xe   : > { %s922_s24 = smov [#allocation7]   ;;  %s763_s28 = scalar_lea.hbm %s1194_s1, 2048 }
   0xf   : > { %s1202_s20 = scalar_select %p990_p8, 1, 0 }
  0x10   : > { %p699_p9 = pneg %p990_p8  ;;  %s144_s25 = sshll.u32 %s922_s24, 4  ;;  %s1002_s25 = int_to_ptr.vmem [resolvable:$true] %s144_s25 }
  0x11   : > { %p764_p11 = scmp.ne.s32.totalorder %s1194_s1, %s763_s28  ;;  %p770_p3 = scmp.lt.u32.totalorder %s763_s28, %s1194_s1 }
  0x12   : > { %p998_p10 = pnand %p699_p9, %p1197_p1 }
  0x14   : > { %p765_p12 = pneg %p998_p10 }
  0x16   : > { %p766_p13 = pnand %p765_p12, %p764_p11 }
  0x18   : > { %p767_p0 = pneg %p766_p13 }
  0x1a   : > { %p772_p5 = pnand %p770_p3, %p767_p0 }
  0x1c   : > { %775 = shalt.err (!%p772_p5)
}
  0x1d   : > { %s776_s6 = scalar_lea.vmem %s132_s22, 2048  ;;  %p784_p2 = scmp.lt.s32.totalorder %s132_s22, %s132_s22 }
  0x1e   : > { %p777_p7 = scmp.ne.s32.totalorder %s132_s22, %s776_s6  ;;  %p785_p6 = scmp.lt.s32.totalorder %s776_s6, %s776_s6 }
  0x20   : > { %p779_p9 = pnand %p777_p7, %p765_p12  ;;  %p786_p4 = por %p785_p6, %p784_p2 }
  0x22   : > { %p780_p1 = pneg %p779_p9 }
  0x24   : > { %p787_p8 = pnand %p786_p4, %p780_p1 }
  0x26   : > { %790 = shalt.err (!%p787_p8)
}
  0x27   : > { %s923_s7 = smov 128   ;;  %s924_s8 = smov 8  }
  0x28   : > { %702 = dma.hbm_to_vmem [thread:$0]  (!%p998_p10), %s1194_s1, 2048, %s132_s22, [#allocation6], %s923_s7, %s923_s7, %s924_s8  }
  0x29   : > { %s791_s21 = scalar_lea.hbm %s1195_s2, 2048 }
  0x2a   : > { %p792_p11 = scmp.ne.s32.totalorder %s1195_s2, %s791_s21  ;;  %p798_p4 = scmp.lt.u32.totalorder %s791_s21, %s1195_s2 }
  0x2c   : > { %p794_p1 = pnand %p792_p11, %p765_p12 }
  0x2e   : > { %p795_p2 = pneg %p794_p1 }
  0x30   : > { %p800_p6 = pnand %p798_p4, %p795_p2 }
  0x32   : > { %803 = shalt.err (!%p800_p6)
}
  0x33   : > { %s804_s22 = scalar_lea.vmem %s1002_s25, 2048  ;;  %p812_p3 = scmp.lt.s32.totalorder %s1002_s25, %s1002_s25 }
  0x34   : > { %p805_p8 = scmp.ne.s32.totalorder %s1002_s25, %s804_s22  ;;  %p813_p5 = scmp.lt.s32.totalorder %s804_s22, %s804_s22 }
  0x36   : > { %p807_p13 = pnand %p805_p8, %p765_p12  ;;  %p814_p7 = por %p813_p5, %p812_p3 }
  0x38   : > { %p808_p0 = pneg %p807_p13 }
  0x3a   : > { %p815_p9 = pnand %p814_p7, %p808_p0 }
  0x3c   : > { %818 = shalt.err (!%p815_p9)
}
  0x3d   : > { %705 = dma.hbm_to_vmem [thread:$0]  (!%p998_p10), %s1195_s2, 2048, %s1002_s25, [#allocation6], %s923_s7, %s923_s7, %s924_s8  }
  0x3e   : > { %s1052_s4 = sadd.s32 1, %s919_s15   ;;  %s27_s23 = sadd.s32 1, %s915_s14 }
  0x3f   : > { %s24_s5 = ssub.s32 %s919_s15, %s1052_s4  ;;  %p34_p12 = scmp.ne.s32.totalorder %s915_s14, %s911_s13 }
  0x40   : > { %p25_p11 = scmp.eq.s32.totalorder %s24_s5, 0  ;;  %p35_p1 = scmp.eq.s32.totalorder %s919_s15, 0 }
  0x41   : > { %p1204_p2 = scmp.eq.s32.totalorder %s971_s16, 2  ;;  %p716_p6 = scmp.lt.s32.totalorder %s919_s15, 3 }
  0x42   : > { %s1068_s9 = scalar_select %p25_p11, %s915_s14, %s27_s23  }
  0x43   : > { %p1062_p4 = por %p1204_p2, %p34_p12  ;;  %p36_p8 = por %p35_p1, %p34_p12 }
  0x44   : > { %s158_s10 = sand.u32 1, %s915_s14   ;;  %s524_s25 = sshll.u32 %s919_s15, 7 }
  0x45   : > { %s523_s11 = sshll.u32 %s158_s10, 3  ;;  %s1075_s17 = scalar_lea.hbm %s1193_s0, %s524_s25 }
  0x46   : > { %s162_s21 = scalar_lea.vmem [#allocation2], %s523_s11  ;;  %p1079_p10 = pnand %p716_p6, %p36_p8 }
  0x47   : > { %s169_s24 = sshll.u32 %s162_s21, 4  ;;  %s159_s27 = scalar_lea.sflag [#allocation3], %s158_s10  ;;  %s1077_s24 = int_to_ptr.vmem [resolvable:$true] %s169_s24 }
  0x48   : > { %s819_s28 = scalar_lea.hbm %s1075_s17, 128  ;;  %p821_p0 = pneg %p1079_p10 }
  0x49   : > { %p820_p13 = scmp.ne.s32.totalorder %s1075_s17, %s819_s28  ;;  %s824_s30 = scalar_lea.hbm %s1193_s0, 384 }
  0x4a   : > { %p825_p7 = scmp.lt.u32.totalorder %s1075_s17, %s1193_s0  ;;  %p826_p9 = scmp.lt.u32.totalorder %s824_s30, %s819_s28 }
  0x4b   : > { %p822_p3 = pnand %p821_p0, %p820_p13  ;;  %p828_p11 = scmp.lt.u32.totalorder %s819_s28, %s1075_s17 }
  0x4c   : > { %p827_p12 = por %p826_p9, %p825_p7 }
  0x4d   : > { %p823_p5 = pneg %p822_p3 }
  0x4e   : > { %p829_p1 = por %p828_p11, %p827_p12 }
  0x50   : > { %p830_p2 = pnand %p829_p1, %p823_p5 }
  0x52   : > { %833 = shalt.err (!%p830_p2)
}
  0x53   : > { %s834_s10 = scalar_lea.vmem %s1077_s24, 128  ;;  %s925_s11 = smov [#allocation2]  }
  0x54   : > { %p835_p6 = scmp.ne.s32.totalorder %s1077_s24, %s834_s10  ;;  %s839_s25 = sshll.u32 %s925_s11, 4  ;;  %s840_s25 = int_to_ptr.vmem [resolvable:$false] %s839_s25 }
  0x55   : > { %s841_s7 = scalar_lea.vmem %s840_s25, 256  ;;  %p842_p3 = scmp.lt.s32.totalorder %s1077_s24, %s840_s25 }
  0x56   : > { %p837_p8 = pnand %p835_p6, %p821_p0  ;;  %p843_p7 = scmp.lt.s32.totalorder %s841_s7, %s834_s10 }
  0x58   : > { %p838_p13 = pneg %p837_p8  ;;  %p844_p9 = por %p843_p7, %p842_p3 }
  0x5a   : > { %p845_p12 = pnand %p844_p9, %p838_p13 }
  0x5c   : > { %848 = shalt.err (!%p845_p12)
}
  0x5d   : > { %709 = dma.hbm_to_vmem [thread:$0]  (!%p1079_p10), %s1075_s17, 128, %s1077_s24, %s159_s27  }
  0x5e   : > { %p1207_p5 = scmp.ne.s32.totalorder %s1202_s20, 0 }
  0x5f   : > { %s1111_s8 = sand.u32 (!%p1207_p5), 1, %s911_s13   ;;  %p1208_p0 = scmp.ne.s32.totalorder (!%p1207_p5), %s1200_s18, 0 }
  0x60   : > { %178 = sbr.rel (%p1207_p5) target bundleno = 401 (0x191), region = 32  ;;  %s526_s21 = sshll.u32 (!%p1207_p5), %s1111_s8, 3 }
  0x61   : > { %s181_s28 = scalar_lea.sflag (!%p1207_p5), [#allocation3], %s1111_s8  ;;  %s1117_s22 = scalar_lea.vmem (!%p1207_p5), [#allocation2], %s526_s21 }
  0x67   : > { %894 = dma.done.wait (%p1208_p0), %s181_s28, 128  }
  0x68   : > { %896 = vsyncadd (%p1208_p0), %s181_s28, 4294967168  ;;  %p1209_p10 = scmp.eq.s32.totalorder %s971_s16, 0 }
  0x6a   : > { %898 = dma.done.wait (%p1209_p10), [#allocation6], 4096   ;;  %p1210_p11 = pmov %p1209_p10 }
  0x6b   : > { %v926_v0 = vmov 0.0|0.0   ;;  %vm927_vm0 = vmmov 0   ;;  %v928_v1 = vmov 0.0   ;;  %v216_v2 = vld [vmem:[#allocation5] sm:$0xff]  ;;  %v217_v3 = vld [vmem:[#allocation5 + $0x8] sm:$0xff]  ;;  %v218_v7 = vld [vmem:[#allocation5 + $0x10] sm:$0xff]  ;;  %v398_v60 = vlaneseq }
  0x6c   : > { %900 = vsyncadd (%p1210_p11), [#allocation6], 4294963200  ;;  %639 = vmatprep.subr.bf16.mxu0 %v926_v0  ;;  %663 = vmatprep.subr.bf16.mxu1 %v926_v0  ;;  %v302_v4 = vld [vmem:[#allocation7] sm:$0xff]  ;;  %v640_v5 = vpack.c.bf16 %v217_v3, %v216_v2  ;;  %v303_v6 = vld [vmem:[#allocation7 + $0x8] sm:$0xff]  ;;  %s532_s18 = sshll.u32 %s971_s16, 7  ;;  %s214_s20 = scalar_lea.vmem [#allocation8], %s526_s21 }
  0x6d   : > { %601 = vmatprep.mubr.msk.f32.mxu0 %vm927_vm0, %v928_v1  ;;  %636 = vmatprep.mubr.msk.f32.mxu1 %vm927_vm0, %v928_v1  ;;  %v219_v8 = vld [vmem:[#allocation5 + $0x18] sm:$0xff]  ;;  %v664_v9 = vpack.c.bf16 %v303_v6, %v302_v4  ;;  %v304_v10 = vld [vmem:[#allocation7 + $0x10] sm:$0xff]  ;;  %v220_v14 = vld [vmem:[#allocation5 + $0x20] sm:$0xff]  ;;  %v399_v61 = vand.u32 127, %v398_v60  ;;  %s429_s17 = sshll.u32 %s214_s20, 4  ;;  %s1150_s27 = scalar_lea.hbm %s1196_s3, %s532_s18  ;;  %s1152_s17 = int_to_ptr.vmem [resolvable:$true] %s429_s17 }
  0x6e   : > { %v305_v11 = vld [vmem:[#allocation7 + $0x18] sm:$0xff]  ;;  %641 = vmatpush3.bf16.msra.mxu0 %v640_v5  ;;  %v643_v12 = vpack.c.bf16 %v219_v8, %v218_v7  ;;  %v221_v15 = vld [vmem:[#allocation5 + $0x28] sm:$0xff]  ;;  %v306_v16 = vld [vmem:[#allocation7 + $0x20] sm:$0xff]  ;;  %s416_s29 = scalar_lea.sflag [#allocation4], %s1111_s8  ;;  %s849_s30 = scalar_lea.vmem %s1152_s17, 128 }
  0x6f   : > { %665 = vmatpush3.bf16.msra.mxu1 %v664_v9  ;;  %642 = vmatprep.subr.bf16.mxu0 %v926_v0  ;;  %v667_v13 = vpack.c.bf16 %v305_v11, %v304_v10  ;;  %v307_v17 = vld [vmem:[#allocation7 + $0x28] sm:$0xff]  ;;  %v646_v18 = vpack.c.bf16 %v221_v15, %v220_v14  ;;  %v222_v20 = vld [vmem:[#allocation5 + $0x30] sm:$0xff]  ;;  %v223_v21 = vld [vmem:[#allocation5 + $0x38] sm:$0xff]  ;;  %v404_v62 = vand.u32 63, %v399_v61  ;;  %p850_p1 = scmp.ne.s32.totalorder %s1152_s17, %s849_s30  ;;  %s929_s16 = smov [#allocation8]  }
  0x70   : > { %666 = vmatprep.subr.bf16.mxu1 %v926_v0  ;;  %v670_v19 = vpack.c.bf16 %v307_v17, %v306_v16  ;;  %v308_v22 = vld [vmem:[#allocation7 + $0x30] sm:$0xff]  ;;  %v309_v23 = vld [vmem:[#allocation7 + $0x38] sm:$0xff]  ;;  %v649_v24 = vpack.c.bf16 %v223_v21, %v222_v20  ;;  %v224_v26 = vld [vmem:[#allocation5 + $0x40] sm:$0xff]  ;;  %s853_s23 = sshll.u32 %s929_s16, 4  ;;  %s854_s23 = int_to_ptr.vmem [resolvable:$false] %s853_s23 }
  0x71   : > { %v673_v25 = vpack.c.bf16 %v309_v23, %v308_v22  ;;  %v225_v27 = vld [vmem:[#allocation5 + $0x48] sm:$0xff]  ;;  %v310_v28 = vld [vmem:[#allocation7 + $0x40] sm:$0xff]  ;;  %v226_v32 = vld [vmem:[#allocation5 + $0x50] sm:$0xff]  ;;  %vm412_vm1 = vcmp.lt.s32.totalorder %v404_v62, 32  ;;  %p851_p2 = pnand %p850_p1, %p1062_p4  ;;  %s855_s5 = scalar_lea.vmem %s854_s23, 256 }
  0x72   : > { %644 = vmatpush3.bf16.msra.mxu0 %v643_v12  ;;  %v311_v29 = vld [vmem:[#allocation7 + $0x48] sm:$0xff]  ;;  %v652_v30 = vpack.c.bf16 %v225_v27, %v224_v26  ;;  %v227_v33 = vld [vmem:[#allocation5 + $0x58] sm:$0xff]  ;;  %v312_v34 = vld [vmem:[#allocation7 + $0x50] sm:$0xff]  ;;  %p856_p8 = scmp.lt.s32.totalorder %s1152_s17, %s854_s23  ;;  %p857_p13 = scmp.lt.s32.totalorder %s855_s5, %s849_s30 }
  0x73   : > { %668 = vmatpush3.bf16.msra.mxu1 %v667_v13  ;;  %645 = vmatprep.subr.bf16.mxu0 %v926_v0  ;;  %v676_v31 = vpack.c.bf16 %v311_v29, %v310_v28  ;;  %v313_v35 = vld [vmem:[#allocation7 + $0x58] sm:$0xff]  ;;  %v655_v36 = vpack.c.bf16 %v227_v33, %v226_v32  ;;  %v228_v38 = vld [vmem:[#allocation5 + $0x60] sm:$0xff]  ;;  %v229_v39 = vld [vmem:[#allocation5 + $0x68] sm:$0xff]  ;;  %p852_p6 = pneg %p851_p2 }
  0x74   : > { %669 = vmatprep.subr.bf16.mxu1 %v926_v0  ;;  %v679_v37 = vpack.c.bf16 %v313_v35, %v312_v34  ;;  %v314_v40 = vld [vmem:[#allocation7 + $0x60] sm:$0xff]  ;;  %v315_v41 = vld [vmem:[#allocation7 + $0x68] sm:$0xff]  ;;  %v658_v42 = vpack.c.bf16 %v229_v39, %v228_v38  ;;  %v230_v44 = vld [vmem:[#allocation5 + $0x70] sm:$0xff]  ;;  %p858_p3 = por %p857_p13, %p856_p8 }
  0x75   : > { %v682_v43 = vpack.c.bf16 %v315_v41, %v314_v40  ;;  %v231_v45 = vld [vmem:[#allocation5 + $0x78] sm:$0xff]  ;;  %v316_v46 = vld [vmem:[#allocation7 + $0x70] sm:$0xff] }
  0x76   : > { %647 = vmatpush3.bf16.msra.mxu0 %v646_v18  ;;  %v317_v47 = vld [vmem:[#allocation7 + $0x78] sm:$0xff]  ;;  %v661_v48 = vpack.c.bf16 %v231_v45, %v230_v44  ;;  %p859_p7 = pnand %p858_p3, %p852_p6 }
  0x77   : > { %671 = vmatpush3.bf16.msra.mxu1 %v670_v19  ;;  %648 = vmatprep.subr.bf16.mxu0 %v926_v0  ;;  %v685_v49 = vpack.c.bf16 %v317_v47, %v316_v46  ;;  %v215_v50 = vld [vmem:[%s1117_s22] sm:$0xff] }
  0x78   : > { %672 = vmatprep.subr.bf16.mxu1 %v926_v0 }
  0x7a   : > { %650 = vmatpush3.bf16.msra.mxu0 %v649_v24 }
  0x7b   : > { %674 = vmatpush3.bf16.msra.mxu1 %v673_v25  ;;  %651 = vmatprep.subr.bf16.mxu0 %v926_v0 }
  0x7c   : > { %675 = vmatprep.subr.bf16.mxu1 %v926_v0 }
  0x7e   : > { %653 = vmatpush3.bf16.msra.mxu0 %v652_v30 }
  0x7f   : > { %677 = vmatpush3.bf16.msra.mxu1 %v676_v31  ;;  %654 = vmatprep.subr.bf16.mxu0 %v926_v0 }
  0x80   : > { %678 = vmatprep.subr.bf16.mxu1 %v926_v0 }
  0x82   : > { %656 = vmatpush3.bf16.msra.mxu0 %v655_v36 }
  0x83   : > { %680 = vmatpush3.bf16.msra.mxu1 %v679_v37  ;;  %657 = vmatprep.subr.bf16.mxu0 %v926_v0 }
  0x84   : > { %681 = vmatprep.subr.bf16.mxu1 %v926_v0 }
  0x86   : > { %659 = vmatpush3.bf16.msra.mxu0 %v658_v42 }
  0x87   : > { %683 = vmatpush3.bf16.msra.mxu1 %v682_v43  ;;  %660 = vmatprep.subr.bf16.mxu0 %v926_v0 }
  0x88   : > { %684 = vmatprep.subr.bf16.mxu1 %v926_v0 }
  0x8a   : > { %662 = vmatpush3.bf16.msra.mxu0 %v661_v48 }
  0x8b   : > { %686 = vmatpush3.bf16.msra.mxu1 %v685_v49 }
  0x8d   : > { %602 = vmatmul.mubr.f32.vlgmr.msra.gmra.mrb[0].mxu0 %v215_v50 }
  0x8e   : > { %637 = vmatmul.mubr.f32.vlgmr.msra.gmra.mrb[0].mxu1 %v215_v50 }
 0x160   : > { %v298_v51 = vpop.f32.mrb[0].mxu0 }
 0x161   : > { %v384_v52 = vpop.f32.mrb[0].mxu1  ;;  %v603_v53 = vpop.f32.mrb[1].mxu0 }
 0x162   : > { %v388_v54 = vadd.f32 %v384_v52, %v298_v51  ;;  %v395_v55 = vsub.f32 %v298_v51, %v384_v52  ;;  %v638_v56 = vpop.f32.mrb[1].mxu1 }
 0x164   : > { %v530_v57 = vmul.f32 -1.442695, %v388_v54 }
 0x166   : > { %759 = vpow2.f32 %v530_v57 }
 0x170   : > { %v760_v58 = vpop.eup %759 }
 0x171   : > { %v392_v59 = vadd.f32 1.0, %v760_v58 }
 0x173   : > { %761 = vrcp.f32 %v392_v59 }
 0x17d   : > { %v762_v63 = vpop.eup %761 }
 0x17e   : > { %v396_v0 = vmul.f32 %v762_v63, %v395_v55 }
 0x180   : > { %v397_v1 = vadd.f32 %v396_v0, %v384_v52 }
 0x182   : > { %v413_v2 = vsel %vm412_vm1, %v397_v1, %v384_v52 }
 0x183   : > { %414 = vst [vmem:[%s214_s20] sm:$0xff] %v413_v2 }
 0x184   : > { %862 = shalt.err (!%p859_p7)
}
 0x185   : > { %s863_s10 = scalar_lea.hbm %s1150_s27, 128  ;;  %s867_s7 = scalar_lea.hbm %s1196_s3, 384 }
 0x186   : > { %p864_p9 = scmp.ne.s32.totalorder %s1150_s27, %s863_s10  ;;  %p868_p0 = scmp.lt.u32.totalorder %s1150_s27, %s1196_s3 }
 0x187   : > { %p869_p10 = scmp.lt.u32.totalorder %s867_s7, %s863_s10  ;;  %p871_p1 = scmp.lt.u32.totalorder %s863_s10, %s1150_s27 }
 0x188   : > { %p865_p12 = pnand %p864_p9, %p1062_p4 }
 0x189   : > { %p870_p11 = por %p869_p10, %p868_p0 }
 0x18a   : > { %p866_p5 = pneg %p865_p12 }
 0x18b   : > { %p872_p2 = por %p871_p1, %p870_p11 }
 0x18d   : > { %p873_p6 = pnand %p872_p2, %p866_p5 }
 0x18f   : > { %876 = shalt.err (!%p873_p6)
}
 0x190   : > { %697 = dma.vmem_to_hbm [thread:$0]  (%p1062_p4), %s1152_s17, 128, %s1150_s27, %s416_s29  }
 0x191 PF: > { %p719_p8 = scmp.ge.s32.totalorder %s919_s15, 2  ;;  %s441_s28 = sand.u32 1, %s907_s12  }
 0x192   : > { %p1211_p13 = scmp.ne.s32.totalorder %s1201_s19, 0  ;;  %s442_s22 = scalar_lea.sflag [#allocation4], %s441_s28 }
 0x194   : > { %p711_p3 = pnand %p719_p8, %p1211_p13 }
 0x196   : > { %902 = dma.done.wait (!%p711_p3), %s442_s22, 128  }
 0x197   : > { %904 = vsyncadd (!%p711_p3), %s442_s22, 4294967168  ;;  %p17_p7 = scmp.ge.s32.totalorder %s1052_s4, 5   ;;  %s1212_s12 = smov %s911_s13 }
 0x198   : > { %s1213_s13 = smov %s915_s14  ;;  %s1214_s14 = smov %s1068_s9 }
 0x199   : > { %s1215_s15 = smov %s1052_s4  ;;  %19 = sbr.rel (!%p17_p7) target bundleno = 6 (0x6), region = 85 }
 0x1a0   :  { %447 = vsyncpa [#allocation3], 1 }
 0x1a1   :  { %449 = vsyncpa [#allocation3 + $0x1], 1 }
 0x1a2   :  { %450 = vsyncpa [#allocation6], 1 }
 0x1a3   :  { %451 = vsyncpa [#allocation4], 1 }
 0x1a4   :  { %453 = vsyncpa [#allocation4 + $0x1], 1 }

</bundles_post_ra>
